<compile_context>
chip_gen: v6e
topology: v6e:2x2x1
jax: 0.10.0
libtpu: 0.0.40
codegen_flags: <defaults>
</compile_context>

<pallas_src>
import functools

import jax
import jax.numpy as jnp
from jax.experimental import pallas as pl
from jax.experimental.pallas import tpu as pltpu


def _channel_mean_kernel(x_ref, o_ref, *, inv_c):
    # x_ref: (b_blk, C, wh_blk). Reduce the channel (sublane) axis directly
    # into an f32 accumulator and multiply by 1/C instead of dividing.
    s = jnp.sum(x_ref[...], axis=1, dtype=jnp.float32)        # (b_blk, wh_blk)
    o_ref[...] = (s * inv_c).astype(o_ref.dtype)


def _block_budget():
    """(target input-block bytes, scoped VMEM limit) per TPU generation."""
    try:
        kind = jax.devices()[0].device_kind.lower()
    except Exception:  # defensive: unknown backend string
        kind = ""
    if "v5" in kind:
        # ~820 GB/s HBM: a 4 MiB block already hides the per-step overhead.
        return 4 * 1024 * 1024, 32 * 1024 * 1024
    if "v7" in kind:
        # ~3.2 TB/s HBM but only 64 MiB VMEM per TensorCore: larger blocks to
        # amortize per-step overhead, keep double-buffered footprint < ~48 MiB.
        return 10 * 1024 * 1024, 48 * 1024 * 1024
    # v6e and unknown chips.
    return 6 * 1024 * 1024, 32 * 1024 * 1024


def p_model_forward(x):
    """x: (N, C, W, H) -> (N, 1, W, H), mean over the channel axis."""
    n, c, w, h = x.shape
    wh = w * h
    itemsize = jnp.dtype(x.dtype).itemsize
    # NOTE: avg_pool1d is float-only in the PyTorch spec; integer inputs would
    # have their f32 mean truncated back to x.dtype here.
    x_flat = x.reshape(n, c, wh)

    target_bytes, vmem_limit = _block_budget()

    # Sublane padding of the channel axis (f32->8, bf16->16, int8->32) counts
    # toward each tile's VMEM footprint.
    sublane = {4: 8, 2: 16, 1: 32}.get(itemsize, 8)
    c_pad = -(-c // sublane) * sublane

    # Lane blocking: prefer the full spatial extent (contiguous per-row DMA,
    # no ragged block); otherwise a multiple of 128 and let Pallas mask the
    # ragged final block -- no host-side pad / slice traffic either way.
    max_aligned = max(128, (target_bytes // (c_pad * itemsize)) // 128 * 128)
    wh_blk = wh if wh <= max_aligned else max_aligned

    # Batch blocking: pack images until the input block reaches the target.
    blk_bytes = c_pad * wh_blk * itemsize
    b_blk = min(n, max(1, target_bytes // blk_bytes))
    if b_blk < n and b_blk > 8:
        b_blk = (b_blk // 8) * 8   # sublane-dense output stores when splitting N

    # Megacore: make sure a non-trivial problem leaves >= 2 grid steps so a
    # v7x chip (2 TensorCores) does not idle half its HBM bandwidth.
    if (pl.cdiv(n, b_blk) * pl.cdiv(wh, wh_blk) < 2
            and n * c * wh * itemsize >= (2 << 20)):
        if wh >= 256:
            wh_blk = max(128, ((pl.cdiv(wh, 2) + 127) // 128) * 128)
        elif n >= 2:
            b_blk = -(-n // 2)

    grid = (pl.cdiv(n, b_blk), pl.cdiv(wh, wh_blk))
    kernel = functools.partial(_channel_mean_kernel, inv_c=float(1.0 / c))

    out = pl.pallas_call(
        kernel,
        out_shape=jax.ShapeDtypeStruct((n, wh), x.dtype),
        grid_spec=pltpu.PrefetchScalarGridSpec(
            num_scalar_prefetch=0,
            grid=grid,
            in_specs=[pl.BlockSpec((b_blk, c, wh_blk), lambda i, j: (i, 0, j))],
            out_specs=pl.BlockSpec((b_blk, wh_blk), lambda i, j: (i, j)),
        ),
        compiler_params=pltpu.CompilerParams(
            # Both grid axes are independent -> shard across both TCs on v7x.
            dimension_semantics=("parallel", "parallel"),
            vmem_limit_bytes=vmem_limit,
        ),
        cost_estimate=pl.CostEstimate(
            flops=n * c * wh,
            transcendentals=0,
            bytes_accessed=(n * c * wh + n * wh) * itemsize,
        ),
    )(x_flat)

    return out.reshape(n, 1, w, h)


if __name__ == "__main__":
    key = jax.random.PRNGKey(0)

    # Shape implied by the module: N * C * W * H.
    N, C, W, H = 2, 4, 16, 16
    x = jax.random.normal(key, (N, C, W, H), dtype=jnp.float32)
    y = p_model_forward(x)
    jax.block_until_ready(y)
    y_ref = jnp.mean(x, axis=1, keepdims=True)
    assert y.shape == (N, 1, W, H)
    assert jnp.allclose(y, y_ref, atol=1e-5, rtol=1e-5)

    # Non-128-aligned spatial extent and odd channel count: exercises the
    # unpadded / masked-boundary path (no host pad, no output slice).
    x2 = jax.random.normal(jax.random.PRNGKey(1), (3, 5, 10, 18), dtype=jnp.float32)
    y2 = p_model_forward(x2)
    jax.block_until_ready(y2)
    assert y2.shape == (3, 1, 10, 18)
    assert jnp.allclose(y2, jnp.mean(x2, axis=1, keepdims=True), atol=1e-5, rtol=1e-5)

    print("KERNEL_OK")
</pallas_src>

<mosaic_0001>
module attributes {stable_mosaic.version = 11 : i64} {
  func.func @_channel_mean_kernel(%arg0: i32, %arg1: i32, %arg2: memref<2x4x256xf32, #tpu.memory_space<vmem>>, %arg3: memref<2x256xf32, #tpu.memory_space<vmem>>) attributes {dimension_semantics = [#tpu.dimension_semantics<parallel>, #tpu.dimension_semantics<parallel>], iteration_bounds = array<i64: 1, 1>, scalar_prefetch = 0 : i64, scratch_operands = 0 : i64, tpu.core_type = #tpu.core_type<tc>, window_params = [{transform_indices = @transform_0, window_bounds = array<i64: 2, 4, 256>}, {transform_indices = @transform_1, window_bounds = array<i64: 2, 256>}]} {
    %c0 = arith.constant 0 : index
    %c0_0 = arith.constant 0 : index
    %c0_1 = arith.constant 0 : index
    %0 = vector.load %arg2[%c0, %c0_0, %c0_1] : memref<2x4x256xf32, #tpu.memory_space<vmem>>, vector<2x4x256xf32>
    %cst = arith.constant dense<0.000000e+00> : vector<2x256xf32>
    %1 = vector.multi_reduction <add>, %0, %cst [1] : vector<2x4x256xf32> to vector<2x256xf32>
    %cst_2 = arith.constant 2.500000e-01 : f32
    %2 = vector.broadcast %cst_2 : f32 to vector<2x256xf32>
    %3 = arith.mulf %1, %2 : vector<2x256xf32>
    %c0_3 = arith.constant 0 : index
    %c0_4 = arith.constant 0 : index
    %4 = vector.load %arg3[%c0_3, %c0_4] : memref<2x256xf32, #tpu.memory_space<vmem>>, vector<2x256xf32>
    tpu.vector_store %arg3[%c0_3, %c0_4], %3 {strides = array<i32>} : memref<2x256xf32, #tpu.memory_space<vmem>>, vector<2x256xf32>,
    return
  }
  func.func @transform_0(%arg0: i32, %arg1: i32) -> (i32, i32, i32) {
    %c0_i32 = arith.constant 0 : i32
    %c0_i32_0 = arith.constant 0 : i32
    return %arg0, %c0_i32, %arg1 : i32, i32, i32
  }
  func.func @transform_1(%arg0: i32, %arg1: i32) -> (i32, i32) {
    %c0_i32 = arith.constant 0 : i32
    return %arg0, %arg1 : i32, i32
  }
}

</mosaic_0001>

<bundles_post_ra>
// kernel: tpu_custom_call.1
= control target key start
LH: loop header
LB: loop body
LE: loop exit
PB: predicated region body
PF: predicated region fallthrough
CT: control target
= control target key end

     0   :  { %6 = vsyncpa [#allocation3], 0  ;;  %s186_s0 = inlined_call_operand.hbm [shape: f32[2,4,256], index: 0, kind: input, shape index: {}]   ;;  %s187_s1 = inlined_call_operand.hbm [shape: f32[2,256], index: 1, kind: output, shape index: {}]  }
   0x1   :  { %7 = vsyncpa [#allocation4], 0  ;;  %s165_s6 = smov [#allocation2]  }
   0x2   :  { %s13_s7 = sshll.u32 %s165_s6, 4  ;;  %s14_s7 = int_to_ptr.vmem [resolvable:$true] %s13_s7 }
   0x3   :  { %s129_s8 = scalar_lea.vmem %s14_s7, 256  ;;  %p134_p1 = scmp.lt.s32.totalorder %s14_s7, %s14_s7 }
   0x4   :  { %p130_p0 = scmp.ne.s32.totalorder %s14_s7, %s129_s8  ;;  %p135_p2 = scmp.lt.s32.totalorder %s129_s8, %s129_s8 }
   0x6   :  { %p136_p3 = por %p135_p2, %p134_p1 }
   0x8   :  { %p137_p4 = pnand %p136_p3, %p130_p0 }
   0xa   :  { %140 = shalt.err (!%p137_p4)
}
   0xb   :  { %s166_s9 = smov 128   ;;  %s167_s10 = smov 8  }
   0xc   :  { %19 = dma.hbm_to_vmem [thread:$0]  %s186_s0, 256, %s14_s7, [#allocation3], %s166_s9, %s166_s9, %s167_s10  }
   0xd   :  { %161 = dma.done.wait [#allocation3], 256  }
   0xe   :  { %162 = vsyncadd [#allocation3], 4294967040  ;;  %vm31_vm0 = vcmask 1043456   ;;  %v23_v0 = vld [vmem:[#allocation2] sm:$0xff]  ;;  %v24_v1 = vld [vmem:[#allocation2 + $0x8] sm:$0xff]  ;;  %v72_v20 = vlaneseq  ;;  %vm89_vm1 = vcmask 1041409  }
   0xf   :  { %v27_v2 = vcombine.high %v23_v0, %v23_v0  ;;  %v28_v3 = vcombine.high %v24_v1, %v24_v1  ;;  %v32_v4 = vsel %vm31_vm0, %v23_v0, 0.0  ;;  %v46_v5 = vsel %vm31_vm0, %v24_v1, 0.0  ;;  %s169_s0 = smov [#allocation5]  }
  0x10   :  { %v33_v6 = vrot.slane %v32_v4, 4  ;;  %v47_v7 = vrot.slane %v46_v5, 4  ;;  %v168_v18 = vmov 1983009808   ;;  %v73_v30 = vshrl.u32 %v72_v20, 7  ;;  %s105_s13 = sshll.u32 %s169_s0, 4  ;;  %s106_s13 = int_to_ptr.vmem [resolvable:$true] %s105_s13 }
  0x11   :  { %v39_v8 = vsel %vm31_vm0, %v27_v2, 0.0  ;;  %v53_v9 = vsel %vm31_vm0, %v28_v3, 0.0  ;;  %v70_v19 = vunpack.c.l.s4 %v168_v18  ;;  %vm91_vm2 = vcmask 1043459   ;;  %s141_s14 = scalar_lea.vmem %s106_s13, 64  ;;  %p146_p6 = scmp.lt.s32.totalorder %s106_s13, %s106_s13 }
  0x12   :  { %v34_v10 = vadd.f32 %v33_v6, %v32_v4  ;;  %v40_v11 = vrot.slane %v39_v8, 4  ;;  %v48_v12 = vadd.f32 %v47_v7, %v46_v5  ;;  %v54_v13 = vrot.slane %v53_v9, 4  ;;  %p142_p5 = scmp.ne.s32.totalorder %s106_s13, %s141_s14  ;;  %p147_p7 = scmp.lt.s32.totalorder %s141_s14, %s141_s14 }
  0x13   :  { %v71_v29 = vunpack.c.0.s8 %v70_v19  ;;  %vm93_vm3 = vcmask 1045509   ;;  %vm95_vm4 = vcmask 1047559  }
  0x14   :  { %v35_v14 = vrot.slane %v34_v10, 2  ;;  %v41_v15 = vadd.f32 %v40_v11, %v39_v8  ;;  %v49_v16 = vrot.slane %v48_v12, 2  ;;  %v55_v17 = vadd.f32 %v54_v13, %v53_v9  ;;  %p148_p8 = por %p147_p7, %p146_p6 }
  0x15   :  { %v74_v41 = vsub.s32 %v71_v29, %v73_v30 }
  0x16   :  { %v36_v21 = vadd.f32 %v35_v14, %v34_v10  ;;  %v42_v22 = vrot.slane %v41_v15, 2  ;;  %v50_v23 = vadd.f32 %v49_v16, %v48_v12  ;;  %v56_v24 = vrot.slane %v55_v17, 2  ;;  %p149_p9 = pnand %p148_p8, %p142_p5 }
  0x18   :  { %v37_v25 = vrot.slane %v36_v21, 1  ;;  %v43_v26 = vadd.f32 %v42_v22, %v41_v15  ;;  %v51_v27 = vrot.slane %v50_v23, 1  ;;  %v57_v28 = vadd.f32 %v56_v24, %v55_v17 }
  0x1a   :  { %v38_v31 = vadd.f32 %v37_v25, %v36_v21  ;;  %v44_v32 = vrot.slane %v43_v26, 1  ;;  %v52_v33 = vadd.f32 %v51_v27, %v50_v23  ;;  %v58_v34 = vrot.slane %v57_v28, 1 }
  0x1c   :  { %v45_v35 = vadd.f32 %v44_v32, %v43_v26  ;;  %v59_v36 = vadd.f32 %v58_v34, %v57_v28  ;;  %v60_v37 = vmul.f32 0.25, %v38_v31  ;;  %v62_v38 = vmul.f32 0.25, %v52_v33 }
  0x1e   :  { %v61_v39 = vmul.f32 0.25, %v45_v35  ;;  %v63_v40 = vmul.f32 0.25, %v59_v36 }
  0x20   :  { %v68_v42 = vcombine.low %v60_v37, %v61_v39  ;;  %v76_v43 = vcombine.low %v62_v38, %v63_v40 }
  0x22   :  { %v75_v44 = vrot.slane %v68_v42, %v74_v41  ;;  %v83_v45 = vrot.slane %v76_v43, %v74_v41 }
  0x24   :  { %v88_v46 = vrot.slane %v83_v45, 7 }
  0x26   :  { %v90_v47 = vsel %vm89_vm1, %v88_v46, %v75_v44 }
  0x27   :  { %v92_v48 = vsel %vm91_vm2, %v88_v46, %v90_v47 }
  0x28   :  { %v94_v49 = vsel %vm93_vm3, %v88_v46, %v92_v48 }
  0x29   :  { %v96_v50 = vsel %vm95_vm4, %v88_v46, %v94_v49 }
  0x2a   :  { %98 = vst [vmem:[#allocation5] sm:$0xf] %v96_v50 }
  0x2b   :  { %152 = shalt.err (!%p149_p9)
}
  0x2c   :  { %108 = dma.vmem_to_hbm [thread:$0]  %s106_s13, 64, %s187_s1, [#allocation4]  }
  0x2d   :  { %163 = dma.done.wait [#allocation4], 64  }
  0x2e   :  { %164 = vsyncadd [#allocation4], 4294967232 }
  0x2f   :  { %112 = vsyncpa [#allocation3], 1 }
  0x30   :  { %113 = vsyncpa [#allocation4], 1 }

</bundles_post_ra>
